<compile_context>
chip_gen: v7x
topology: tpu7x:2x2x1
jax: 0.10.0
libtpu: 0.0.40
codegen_flags: <defaults>
</compile_context>

<pallas_src>
import functools

import jax
import jax.numpy as jnp
from jax.experimental import pallas as pl
from jax.experimental.pallas import tpu as pltpu

_LANE = 128
_SUBLANE = 8
_BLOCK_ROWS = 4096          # 4096 x 128 f32 = 2 MiB per input block


def _cdiv(a, b):
    return -(-a // b)


def _l1_partial_kernel(p_ref, g_ref, out_ref, *, block_rows, valid_rows,
                       steps_per_core, need_mask):
    """Accumulate per-core partial sums of |p - g| into a (1, 8, 128) slab."""
    c = pl.program_id(0)   # TensorCore-parallel axis
    i = pl.program_id(1)   # streaming / reduction axis

    @pl.when(i == 0)
    def _init():
        out_ref[...] = jnp.zeros_like(out_ref)

    # Cast in-kernel: HBM traffic stays in the source dtype (e.g. bf16).
    diff = jnp.abs(p_ref[...].astype(jnp.float32) -
                   g_ref[...].astype(jnp.float32))

    if need_mask:
        # Zero rows beyond the logical end (partial last block / padded grid
        # steps that were clamped onto the last real block).
        logical_block = c * steps_per_core + i
        row_idx = (logical_block * block_rows +
                   jax.lax.broadcasted_iota(jnp.int32, diff.shape, 0))
        diff = jnp.where(row_idx < valid_rows, diff, 0.0)

    # Fold (block_rows, 128) into an (8, 128) vreg-aligned partial sum:
    # pure VPU adds, no cross-lane traffic in the hot loop.
    partial = diff.reshape(block_rows // _SUBLANE, _SUBLANE, _LANE).sum(axis=0)
    out_ref[...] += partial[None, :, :]


@jax.jit
def _l1_mean(pred, gt):
    n_elems = pred.size
    p = pred.reshape(-1)
    g = gt.reshape(-1)

    # Lane-dense (rows, 128) view. Only pad (a copy) in the rare case the
    # element count is not a multiple of 8*128; padded zeros in both inputs
    # contribute |0 - 0| = 0 to the sum.
    chunk = _SUBLANE * _LANE
    pad = (-n_elems) % chunk
    if pad:
        p = jnp.pad(p, (0, pad))
        g = jnp.pad(g, (0, pad))
    rows = p.shape[0] // _LANE            # multiple of 8
    p2 = p.reshape(rows, _LANE)
    g2 = g.reshape(rows, _LANE)

    block_rows = min(_BLOCK_ROWS, rows)   # both multiples of 8
    num_blocks = _cdiv(rows, block_rows)

    # Split the stream across TensorCores (2x HBM paths on v7x; harmless,
    # i.e. serial, on single-core v5e/v6e).
    ncores = 2 if num_blocks >= 2 else 1
    steps = _cdiv(num_blocks, ncores)
    need_mask = (ncores * steps * block_rows) != rows

    if ncores * steps == num_blocks:
        in_map = lambda c, i: (c * steps + i, 0)
    else:
        # Odd block count: clamp padded grid steps onto the last real block;
        # the in-kernel row mask zeroes their contribution.
        last = num_blocks - 1
        in_map = lambda c, i: (jnp.minimum(c * steps + i, last), 0)

    kernel = functools.partial(
        _l1_partial_kernel,
        block_rows=block_rows,
        valid_rows=rows,
        steps_per_core=steps,
        need_mask=need_mask,
    )

    partials = pl.pallas_call(
        kernel,
        out_shape=jax.ShapeDtypeStruct((ncores, _SUBLANE, _LANE), jnp.float32),
        grid=(ncores, steps),
        in_specs=[
            pl.BlockSpec((block_rows, _LANE), in_map),
            pl.BlockSpec((block_rows, _LANE), in_map),
        ],
        out_specs=pl.BlockSpec((1, _SUBLANE, _LANE), lambda c, i: (c, 0, 0)),
        compiler_params=pltpu.CompilerParams(
            dimension_semantics=("parallel", "arbitrary"),
            vmem_limit_bytes=32 * 1024 * 1024,
        ),
    )(p2, g2)

    # Single tiny cross-lane reduce + mean, outside the hot loop.
    return jnp.sum(partials) / jnp.float32(n_elems)


class L1LossWrapper:
    """JAX/Pallas port of the PyTorch L1LossWrapper module."""

    def __init__(self, subname=""):
        self.subname = subname

    def __call__(self, pred_img, gt_img):
        err = _l1_mean(pred_img, gt_img)
        return {"L1" + self.subname: err, "Total Loss": err}


if __name__ == "__main__":
    key = jax.random.PRNGKey(0)
    k1, k2 = jax.random.split(key)
    # NCHW, small shapes: batch=2, channels=4, spatial=16
    pred = jax.random.normal(k1, (2, 4, 16, 16), dtype=jnp.float32)
    gt = jax.random.normal(k2, (2, 4, 16, 16), dtype=jnp.float32)

    loss_mod = L1LossWrapper()
    out = loss_mod(pred, gt)
    jax.block_until_ready(out)

    # Reference check (plain JAX), mirrors nn.L1Loss() default 'mean' reduction.
    ref = jnp.mean(jnp.abs(pred - gt))
    assert jnp.allclose(out["L1"], ref, rtol=1e-5, atol=1e-6)
    assert jnp.allclose(out["Total Loss"], ref, rtol=1e-5, atol=1e-6)

    print("KERNEL_OK")
</pallas_src>

<mosaic_0001>
module attributes {stable_mosaic.version = 11 : i64} {
  func.func @_l1_partial_kernel(%arg0: i32, %arg1: i32, %arg2: memref<16x128xf32, #tpu.memory_space<vmem>>, %arg3: memref<16x128xf32, #tpu.memory_space<vmem>>, %arg4: memref<1x8x128xf32, #tpu.memory_space<vmem>>) attributes {dimension_semantics = [#tpu.dimension_semantics<parallel>, #tpu.dimension_semantics<arbitrary>], iteration_bounds = array<i64: 1, 1>, scalar_prefetch = 0 : i64, scratch_operands = 0 : i64, tpu.core_type = #tpu.core_type<tc>, window_params = [{transform_indices = @transform_0, window_bounds = array<i64: 16, 128>}, {transform_indices = @transform_1, window_bounds = array<i64: 16, 128>}, {transform_indices = @transform_2, window_bounds = array<i64: 1, 8, 128>}]} {
    %c0_i32 = arith.constant 0 : i32
    %0 = arith.cmpi eq, %arg1, %c0_i32 : i32
    %1 = arith.extui %0 : i1 to i32
    %c0_i32_0 = arith.constant 0 : i32
    %2 = arith.cmpi ne, %1, %c0_i32_0 : i32
    scf.if %2 {
      %cst_10 = arith.constant 0.000000e+00 : f32
      %13 = vector.broadcast %cst_10 : f32 to vector<1x8x128xf32>
      %c0_11 = arith.constant 0 : index
      %c0_12 = arith.constant 0 : index
      %c0_13 = arith.constant 0 : index
      %14 = vector.load %arg4[%c0_11, %c0_12, %c0_13] : memref<1x8x128xf32, #tpu.memory_space<vmem>>, vector<1x8x128xf32>
      tpu.vector_store %arg4[%c0_11, %c0_12, %c0_13], %13 {strides = array<i32>} : memref<1x8x128xf32, #tpu.memory_space<vmem>>, vector<1x8x128xf32>,
    } else {
    }
    %c0 = arith.constant 0 : index
    %c0_1 = arith.constant 0 : index
    %3 = vector.load %arg2[%c0, %c0_1] : memref<16x128xf32, #tpu.memory_space<vmem>>, vector<16x128xf32>
    %c0_2 = arith.constant 0 : index
    %c0_3 = arith.constant 0 : index
    %4 = vector.load %arg3[%c0_2, %c0_3] : memref<16x128xf32, #tpu.memory_space<vmem>>, vector<16x128xf32>
    %5 = arith.subf %3, %4 : vector<16x128xf32>
    %6 = math.absf %5 : vector<16x128xf32>
    %7 = vector.shape_cast %6 : vector<16x128xf32> to vector<2x8x128xf32>
    %cst = arith.constant dense<0.000000e+00> : vector<8x128xf32>
    %8 = vector.multi_reduction <add>, %7, %cst [0] : vector<2x8x128xf32> to vector<8x128xf32>
    %c0_4 = arith.constant 0 : index
    %c0_5 = arith.constant 0 : index
    %c0_6 = arith.constant 0 : index
    %9 = vector.load %arg4[%c0_4, %c0_5, %c0_6] : memref<1x8x128xf32, #tpu.memory_space<vmem>>, vector<1x8x128xf32>
    %10 = vector.shape_cast %8 : vector<8x128xf32> to vector<1x8x128xf32>
    %11 = arith.addf %9, %10 : vector<1x8x128xf32>
    %c0_7 = arith.constant 0 : index
    %c0_8 = arith.constant 0 : index
    %c0_9 = arith.constant 0 : index
    %12 = vector.load %arg4[%c0_7, %c0_8, %c0_9] : memref<1x8x128xf32, #tpu.memory_space<vmem>>, vector<1x8x128xf32>
    tpu.vector_store %arg4[%c0_7, %c0_8, %c0_9], %11 {strides = array<i32>} : memref<1x8x128xf32, #tpu.memory_space<vmem>>, vector<1x8x128xf32>,
    return
  }
  func.func @transform_0(%arg0: i32, %arg1: i32) -> (i32, i32) {
    %c1_i32 = arith.constant 1 : i32
    %0 = arith.muli %arg0, %c1_i32 : i32
    %1 = arith.addi %0, %arg1 : i32
    %c0_i32 = arith.constant 0 : i32
    %c0_i32_0 = arith.constant 0 : i32
    return %1, %c0_i32 : i32, i32
  }
  func.func @transform_1(%arg0: i32, %arg1: i32) -> (i32, i32) {
    %c1_i32 = arith.constant 1 : i32
    %0 = arith.muli %arg0, %c1_i32 : i32
    %1 = arith.addi %0, %arg1 : i32
    %c0_i32 = arith.constant 0 : i32
    %c0_i32_0 = arith.constant 0 : i32
    return %1, %c0_i32 : i32, i32
  }
  func.func @transform_2(%arg0: i32, %arg1: i32) -> (i32, i32, i32) {
    %c0_i32 = arith.constant 0 : i32
    %c0_i32_0 = arith.constant 0 : i32
    %c0_i32_1 = arith.constant 0 : i32
    return %arg0, %c0_i32, %c0_i32_0 : i32, i32, i32
  }
}

</mosaic_0001>

<bundles_post_ra>
// kernel: _l1_mean.1
= control target key start
LH: loop header
LB: loop body
LE: loop exit
PB: predicated region body
PF: predicated region fallthrough
CT: control target
= control target key end

     0   :  { %s119_s0 = inlined_call_operand.vmem [shape: f32[16,128], index: 0, kind: input, shape index: {}]   ;;  %s120_s1 = inlined_call_operand.vmem [shape: f32[16,128], index: 1, kind: input, shape index: {}]   ;;  %s121_s2 = inlined_call_operand.vmem [shape: f32[1,8,128], index: 2, kind: output, shape index: {}]  }
   0x1   :  { %v60_v0 = vld [vmem:[%s119_s0] sm:$0xff]  ;;  %v61_v1 = vld [vmem:[%s119_s0 + $0x8] sm:$0xff] }
   0x2   :  { %v62_v2 = vld [vmem:[%s120_s1] sm:$0xff]  ;;  %v63_v3 = vld [vmem:[%s120_s1 + $0x8] sm:$0xff] }
   0x3   :  { %v64_v4 = vsub.f32 %v60_v0, %v62_v2  ;;  %v65_v5 = vsub.f32 %v61_v1, %v63_v3 }
   0x5   :  { %v66_v6 = vand.u32 2147483647, %v64_v4  ;;  %v67_v7 = vand.u32 2147483647, %v65_v5 }
   0x7   :  { %v68_v8 = vadd.f32 %v67_v7, %v66_v6 }
   0x9   :  { %71 = vst [vmem:[%s121_s2] sm:$0xff] %v68_v8 }

</bundles_post_ra>
